<compile_context>
chip_gen: v5e
topology: v5e:2x2
jax: 0.10.0
libtpu: 0.0.40
codegen_flags: <defaults>
</compile_context>

<pallas_src>
import jax
import jax.numpy as jnp
import numpy as np
from jax.experimental import pallas as pl
from jax.experimental.pallas import tpu as pltpu


def _round_up(x, m):
    return ((x + m - 1) // m) * m


# ---------------------------------------------------------------------------
# Pallas kernel: one (row-block, vocab-slab) grid step
# ---------------------------------------------------------------------------
def atom_feature_kernel(x_ref, table_ref, out_ref, acc_ref):
    """
    x_ref:     [Rb, F]  int32     augmented atom indices for Rb flattened rows
    table_ref: [tV, H]  bfloat16  one contraction slab of the augmented table
    out_ref:   [Rb, H]  out dtype
    acc_ref:   [Rb, H]  float32   accumulator across vocab slabs (VMEM scratch)
    """
    k = pl.program_id(1)

    @pl.when(k == 0)
    def _init():
        acc_ref[...] = jnp.zeros_like(acc_ref)

    Rb, F = x_ref.shape
    tV, _ = table_ref.shape
    base = k * tV

    idx = x_ref[...]                                                    # [Rb, F]
    lane_ids = jax.lax.broadcasted_iota(jnp.int32, (Rb, tV), 1) + base  # [Rb, tV]

    # Multi-hot counts for this vocab slab.  Values are exact small integers
    # (0..F), so bf16 is exact; bf16 operands hit the fast MXU path and halve
    # the live-intermediate footprint vs f32.
    counts = jnp.zeros((Rb, tV), jnp.bfloat16)
    for f in range(F):                     # F is tiny & static -> unrolls
        counts = counts + (idx[:, f][:, None] == lane_ids).astype(jnp.bfloat16)

    acc_ref[...] += jnp.dot(counts, table_ref[...],
                            preferred_element_type=jnp.float32)

    @pl.when(k == pl.num_programs(1) - 1)
    def _store():
        out_ref[...] = acc_ref[...].astype(out_ref.dtype)   # lane-dense store


# ---------------------------------------------------------------------------
# Wrapper
# ---------------------------------------------------------------------------
def atom_feature_forward(x, atom_table, graph_token, *,
                         block_rows=None, block_vocab=512,
                         out_dtype=jnp.bfloat16):
    """x: [B, N, F] int indices; atom_table: [V, H]; graph_token: [1, H]."""
    B, N, F = x.shape
    V, H = atom_table.shape
    T = N + 1
    rows = B * T

    # --- augmented table: [0..V-1] atoms, [V] graph token, [V+1] zero row ---
    Vp = _round_up(V + 2, 128)
    tV = min(_round_up(block_vocab, 128), Vp)
    Vp = _round_up(Vp, tV)
    table_aug = jnp.zeros((Vp, H), jnp.bfloat16)
    table_aug = table_aug.at[:V].set(atom_table.astype(jnp.bfloat16))
    table_aug = table_aug.at[V].set(graph_token.reshape(H).astype(jnp.bfloat16))

    # --- flatten (B, T) -> rows outside the kernel (no in-kernel reshapes) ---
    # virtual "token atom": feature 0 -> graph-token row, others -> zero row
    tok_row = jnp.full((B, 1, F), V + 1, dtype=jnp.int32).at[:, :, 0].set(V)
    x_aug = jnp.concatenate([tok_row, x.astype(jnp.int32)], axis=1)   # [B, T, F]
    x_flat = x_aug.reshape(rows, F)

    # --- row-block sizing: big enough to amortize per-step overhead, but at
    #     least 2 row blocks so v7x's two TensorCores both get work. ---------
    if block_rows is None:
        block_rows = 512
        while block_rows > 8 and -(-rows // block_rows) < 2:
            block_rows //= 2
    block_rows = max(8, (block_rows // 8) * 8)
    rows_p = _round_up(rows, block_rows)
    if rows_p != rows:
        pad = jnp.full((rows_p - rows, F), V + 1, dtype=jnp.int32)  # -> zero row
        x_flat = jnp.concatenate([x_flat, pad], axis=0)

    grid = (rows_p // block_rows, Vp // tV)

    out_itemsize = jnp.dtype(out_dtype).itemsize
    vmem_bytes = (
        2 * block_rows * F * 4                 # x blocks (double-buffered)
        + 2 * tV * H * 2                       # table slabs (double-buffered)
        + 2 * block_rows * H * out_itemsize    # out blocks (double-buffered)
        + block_rows * H * 4                   # f32 accumulator scratch
        + 2 * block_rows * tV * 2              # live bf16 one-hot slab headroom
    )
    vmem_limit = int(min(64 * 1024 * 1024, max(4 * 1024 * 1024, 2 * vmem_bytes)))

    cost = pl.CostEstimate(
        flops=2 * rows_p * Vp * H,
        transcendentals=0,
        bytes_accessed=rows_p * F * 4 + Vp * H * 2 + rows_p * H * out_itemsize,
    )

    out_flat = pl.pallas_call(
        atom_feature_kernel,
        out_shape=jax.ShapeDtypeStruct((rows_p, H), out_dtype),
        grid=grid,
        in_specs=[
            pl.BlockSpec((block_rows, F), lambda i, k: (i, 0)),   # row chunk
            pl.BlockSpec((tV, H), lambda i, k: (k, 0)),           # vocab slab
        ],
        out_specs=pl.BlockSpec((block_rows, H), lambda i, k: (i, 0)),
        scratch_shapes=[pltpu.VMEM((block_rows, H), jnp.float32)],
        compiler_params=pltpu.CompilerParams(
            dimension_semantics=("parallel", "arbitrary"),
            vmem_limit_bytes=vmem_limit,
        ),
        cost_estimate=cost,
    )(x_flat, table_aug)

    return out_flat[:rows].reshape(B, T, H)


# ---------------------------------------------------------------------------
if __name__ == "__main__":
    # Small shapes implied by the module: B graphs, N atoms, F atom features,
    # vocab V, hidden H (H = 128 keeps the output lane-dense).
    B, N, F = 16, 15, 4
    V, H = 64, 128

    key = jax.random.PRNGKey(0)
    k_tab, k_tok, k_x = jax.random.split(key, 3)

    # init_params(): Embedding weights ~ N(0, 0.02) (padding row re-randomized).
    atom_table = 0.02 * jax.random.normal(k_tab, (V, H), jnp.float32)
    graph_token = 0.02 * jax.random.normal(k_tok, (1, H), jnp.float32)

    x = jax.random.randint(k_x, (B, N, F), 0, V, dtype=jnp.int32)
    x = x.at[1, N - 1, :].set(0)  # one "padded" atom (index 0) in graph 1

    out = atom_feature_forward(x, atom_table, graph_token)
    out = jax.block_until_ready(out)

    # Pure-JAX reference == AtomFeature.forward
    node_feature = atom_table[x].sum(axis=-2)                                   # [B, N, H]
    ref = jnp.concatenate(
        [jnp.broadcast_to(graph_token[None, :, :], (B, 1, H)), node_feature], axis=1)

    assert out.shape == (B, N + 1, H)
    np.testing.assert_allclose(np.asarray(out, dtype=np.float32),
                               np.asarray(ref, dtype=np.float32),
                               rtol=2e-2, atol=2e-3)
    print("KERNEL_OK")
</pallas_src>

<mosaic_0001>
module attributes {stable_mosaic.version = 11 : i64} {
  func.func @atom_feature_kernel(%arg0: i32, %arg1: i32, %arg2: memref<128x4xi32, #tpu.memory_space<vmem>>, %arg3: memref<128x128xbf16, #tpu.memory_space<vmem>>, %arg4: memref<128x128xbf16, #tpu.memory_space<vmem>>, %arg5: memref<128x128xf32, #tpu.memory_space<vmem>>) attributes {dimension_semantics = [#tpu.dimension_semantics<parallel>, #tpu.dimension_semantics<arbitrary>], iteration_bounds = array<i64: 2, 1>, scalar_prefetch = 0 : i64, scratch_operands = 1 : i64, tpu.core_type = #tpu.core_type<tc>, window_params = [{transform_indices = @transform_0, window_bounds = array<i64: 128, 4>}, {transform_indices = @transform_1, window_bounds = array<i64: 128, 128>}, {transform_indices = @transform_2, window_bounds = array<i64: 128, 128>}]} {
    %c0_i32 = arith.constant 0 : i32
    %0 = arith.cmpi eq, %arg1, %c0_i32 : i32
    %1 = arith.extui %0 : i1 to i32
    %c0_i32_0 = arith.constant 0 : i32
    %2 = arith.cmpi ne, %1, %c0_i32_0 : i32
    scf.if %2 {
      %cst_11 = arith.constant 0.000000e+00 : f32
      %53 = vector.broadcast %cst_11 : f32 to vector<128x128xf32>
      %c0_12 = arith.constant 0 : index
      %c0_13 = arith.constant 0 : index
      %54 = vector.load %arg5[%c0_12, %c0_13] : memref<128x128xf32, #tpu.memory_space<vmem>>, vector<128x128xf32>
      tpu.vector_store %arg5[%c0_12, %c0_13], %53 {strides = array<i32>} : memref<128x128xf32, #tpu.memory_space<vmem>>, vector<128x128xf32>,
    } else {
    }
    %c128_i32 = arith.constant 128 : i32
    %3 = arith.muli %arg1, %c128_i32 : i32
    %c0 = arith.constant 0 : index
    %c0_1 = arith.constant 0 : index
    %4 = vector.load %arg2[%c0, %c0_1] : memref<128x4xi32, #tpu.memory_space<vmem>>, vector<128x4xi32>
    %5 = tpu.iota {dimensions = array<i32: 1>} : vector<128x128xi32>
    %6 = vector.broadcast %3 : i32 to vector<128x128xi32>
    %7 = arith.addi %5, %6 : vector<128x128xi32>
    %cst = arith.constant 0.000000e+00 : bf16
    %8 = vector.broadcast %cst : bf16 to vector<128x128xbf16>
    %9 = vector.extract_strided_slice %4 {offsets = [0, 0], sizes = [128, 1], strides = [1, 1]} : vector<128x4xi32> to vector<128x1xi32>
    %10 = vector.shape_cast %9 : vector<128x1xi32> to vector<128xi32>
    %11 = vector.shape_cast %10 : vector<128xi32> to vector<128x1xi32>
    %12 = vector.broadcast %11 : vector<128x1xi32> to vector<128x128xi32>
    %13 = arith.cmpi eq, %12, %7 : vector<128x128xi32>
    %14 = arith.extui %13 : vector<128x128xi1> to vector<128x128xi32>
    %15 = arith.sitofp %14 : vector<128x128xi32> to vector<128x128xf32>
    %16 = arith.truncf %15 : vector<128x128xf32> to vector<128x128xbf16>
    %17 = arith.addf %8, %16 : vector<128x128xbf16>
    %18 = vector.extract_strided_slice %4 {offsets = [0, 1], sizes = [128, 1], strides = [1, 1]} : vector<128x4xi32> to vector<128x1xi32>
    %19 = vector.shape_cast %18 : vector<128x1xi32> to vector<128xi32>
    %20 = vector.shape_cast %19 : vector<128xi32> to vector<128x1xi32>
    %21 = vector.broadcast %20 : vector<128x1xi32> to vector<128x128xi32>
    %22 = arith.cmpi eq, %21, %7 : vector<128x128xi32>
    %23 = arith.extui %22 : vector<128x128xi1> to vector<128x128xi32>
    %24 = arith.sitofp %23 : vector<128x128xi32> to vector<128x128xf32>
    %25 = arith.truncf %24 : vector<128x128xf32> to vector<128x128xbf16>
    %26 = arith.addf %17, %25 : vector<128x128xbf16>
    %27 = vector.extract_strided_slice %4 {offsets = [0, 2], sizes = [128, 1], strides = [1, 1]} : vector<128x4xi32> to vector<128x1xi32>
    %28 = vector.shape_cast %27 : vector<128x1xi32> to vector<128xi32>
    %29 = vector.shape_cast %28 : vector<128xi32> to vector<128x1xi32>
    %30 = vector.broadcast %29 : vector<128x1xi32> to vector<128x128xi32>
    %31 = arith.cmpi eq, %30, %7 : vector<128x128xi32>
    %32 = arith.extui %31 : vector<128x128xi1> to vector<128x128xi32>
    %33 = arith.sitofp %32 : vector<128x128xi32> to vector<128x128xf32>
    %34 = arith.truncf %33 : vector<128x128xf32> to vector<128x128xbf16>
    %35 = arith.addf %26, %34 : vector<128x128xbf16>
    %36 = vector.extract_strided_slice %4 {offsets = [0, 3], sizes = [128, 1], strides = [1, 1]} : vector<128x4xi32> to vector<128x1xi32>
    %37 = vector.shape_cast %36 : vector<128x1xi32> to vector<128xi32>
    %38 = vector.shape_cast %37 : vector<128xi32> to vector<128x1xi32>
    %39 = vector.broadcast %38 : vector<128x1xi32> to vector<128x128xi32>
    %40 = arith.cmpi eq, %39, %7 : vector<128x128xi32>
    %41 = arith.extui %40 : vector<128x128xi1> to vector<128x128xi32>
    %42 = arith.sitofp %41 : vector<128x128xi32> to vector<128x128xf32>
    %43 = arith.truncf %42 : vector<128x128xf32> to vector<128x128xbf16>
    %44 = arith.addf %35, %43 : vector<128x128xbf16>
    %c0_2 = arith.constant 0 : index
    %c0_3 = arith.constant 0 : index
    %45 = vector.load %arg5[%c0_2, %c0_3] : memref<128x128xf32, #tpu.memory_space<vmem>>, vector<128x128xf32>
    %c0_4 = arith.constant 0 : index
    %c0_5 = arith.constant 0 : index
    %46 = vector.load %arg3[%c0_4, %c0_5] : memref<128x128xbf16, #tpu.memory_space<vmem>>, vector<128x128xbf16>
    %cst_6 = arith.constant dense<0.000000e+00> : vector<128x128xf32>
    %47 = tpu.matmul %44, %46, %cst_6 {dimension_numbers = #tpu.dot_dimension_numbers<[1], [0], [0], [1], [0, 0, 1, 1], [], []>} : vector<128x128xbf16>, vector<128x128xbf16>, vector<128x128xf32> -> vector<128x128xf32>
    %48 = arith.addf %45, %47 : vector<128x128xf32>
    %c0_7 = arith.constant 0 : index
    %c0_8 = arith.constant 0 : index
    %49 = vector.load %arg5[%c0_7, %c0_8] : memref<128x128xf32, #tpu.memory_space<vmem>>, vector<128x128xf32>
    tpu.vector_store %arg5[%c0_7, %c0_8], %48 {strides = array<i32>} : memref<128x128xf32, #tpu.memory_space<vmem>>, vector<128x128xf32>,
    %c0_i32_9 = arith.constant 0 : i32
    %50 = arith.cmpi eq, %arg1, %c0_i32_9 : i32
    %51 = arith.extui %50 : i1 to i32
    %c0_i32_10 = arith.constant 0 : i32
    %52 = arith.cmpi ne, %51, %c0_i32_10 : i32
    scf.if %52 {
      %c0_11 = arith.constant 0 : index
      %c0_12 = arith.constant 0 : index
      %53 = vector.load %arg5[%c0_11, %c0_12] : memref<128x128xf32, #tpu.memory_space<vmem>>, vector<128x128xf32>
      %54 = arith.truncf %53 : vector<128x128xf32> to vector<128x128xbf16>
      %c0_13 = arith.constant 0 : index
      %c0_14 = arith.constant 0 : index
      %55 = vector.load %arg4[%c0_13, %c0_14] : memref<128x128xbf16, #tpu.memory_space<vmem>>, vector<128x128xbf16>
      tpu.vector_store %arg4[%c0_13, %c0_14], %54 {strides = array<i32>} : memref<128x128xbf16, #tpu.memory_space<vmem>>, vector<128x128xbf16>,
    } else {
    }
    return
  }
  func.func @transform_0(%arg0: i32, %arg1: i32) -> (i32, i32) {
    %c0_i32 = arith.constant 0 : i32
    %c0_i32_0 = arith.constant 0 : i32
    return %arg0, %c0_i32 : i32, i32
  }
  func.func @transform_1(%arg0: i32, %arg1: i32) -> (i32, i32) {
    %c0_i32 = arith.constant 0 : i32
    %c0_i32_0 = arith.constant 0 : i32
    return %arg1, %c0_i32 : i32, i32
  }
  func.func @transform_2(%arg0: i32, %arg1: i32) -> (i32, i32) {
    %c0_i32 = arith.constant 0 : i32
    %c0_i32_0 = arith.constant 0 : i32
    return %arg0, %c0_i32 : i32, i32
  }
}

</mosaic_0001>

<bundles_post_ra>
// kernel: tpu_custom_call.1
= control target key start
LH: loop header
LB: loop body
LE: loop exit
PB: predicated region body
PF: predicated region fallthrough
CT: control target
= control target key end

     0   :  { %7 = vsyncpa [#allocation4], 0  ;;  %s2064_s0 = inlined_call_operand.vmem [shape: s32[256,4], index: 0, kind: input, shape index: {}]   ;;  %s2065_s1 = inlined_call_operand.vmem [shape: bf16[128,128], index: 1, kind: input, shape index: {}]   ;;  %s2066_s2 = inlined_call_operand.hbm [shape: bf16[256,128], index: 2, kind: output, shape index: {}]  }
   0x1   :  { %9 = vsyncpa [#allocation4 + $0x1], 0  ;;  %s1587_s9 = smov 0   ;;  %s1589_s10 = smov 0  }
   0x2   :  { %s1591_s11 = smov 0   ;;  %s1593_s12 = smov 0  }
   0x3   :  { %s1595_s13 = smov 0   ;;  %s1597_s14 = smov 0  }
   0x4 LB: > { %s1213_s15 = sadd.s32 4294967295, %s1563_s14   ;;  %s1214_s16 = sadd.s32 4294967294, %s1563_s14   ;;  %s1563_s14 = sphi %s1597_s14, %s15_s14   ;;  %s1559_s13 = sphi %s1595_s13, %s2073_s13   ;;  %s1555_s12 = sphi %s1593_s12, %s2072_s12   ;;  %s1551_s11 = sphi %s1591_s11, %s2071_s11   ;;  %s1547_s10 = sphi %s1589_s10, %s2070_s10   ;;  %s1543_s9 = sphi %s1587_s9, %s2069_s9  }
   0x5   : > { %s27_s17 = sadd.s32 1, %s1559_s13  ;;  %s86_s18 = sadd.s32 1, %s1551_s11 }
   0x6   : > { %p29_p0 = scmp.ge.s32.totalorder %s27_s17, 2  ;;  %p96_p1 = scmp.ne.s32.totalorder %s1551_s11, %s1547_s10 }
   0x7   : > { %p97_p2 = scmp.eq.s32.totalorder %s1213_s15, 1  ;;  %p102_p3 = scmp.ne.s32.totalorder %s1547_s10, %s1543_s9 }
   0x8   : > { %s2075_s17 = smov (%p29_p0, %s27_s17), 0  ;;  %p103_p5 = scmp.eq.s32.totalorder %s1214_s16, 1 }
   0x9   : > { %p1627_p4 = por %p97_p2, %p96_p1  ;;  %s83_s20 = ssub.s32 %s1559_s13, %s2075_s17 }
   0xa   : > { %p1218_p6 = scmp.ge.s32.totalorder %s1563_s14, 1  ;;  %p84_p7 = scmp.eq.s32.totalorder %s83_s20, 0 }
   0xb   : > { %p1634_p8 = por %p103_p5, %p102_p3  ;;  %p139_p9 = scmp.lt.s32.totalorder %s1563_s14, 3 }
   0xc   : > { %s1640_s22 = scalar_select %p84_p7, %s1551_s11, %s86_s18  }
   0xd   : > { %p140_p10 = pnand %p1218_p6, %p139_p9 }
   0xe   : > { %s1220_s23 = sshll.u32 (!%p140_p10), %s1555_s12, 4  ;;  %s163_s26 = sand.u32 (!%p140_p10), 1, %s1547_s10  }
   0xf   : > { %143 = sbr.rel (%p140_p10) target bundleno = 470 (0x1d6), region = 28  ;;  %p167_p11 = scmp.lt.s32.totalorder (!%p140_p10), %s1220_s23, 31 }
  0x10   : > { %s1331_s29 = sshll.u32 (!%p140_p10), %s1555_s12, 6  ;;  %s1113_s7 = scalar_lea.sflag (!%p140_p10), [#allocation4], %s163_s26 }
  0x11   : > { %s1124_s4 = scalar_lea.hbm (!%p140_p10), %s2066_s2, %s1331_s29  ;;  %s1505_s18 = scalar_lea.hbm (!%p140_p10), %s2066_s2, 128 }
  0x12   : > { %s1127_s6 = sshll.u32 (!%p140_p10), %s1124_s4, 4  ;;  %s1128_s6 = int_to_ptr.hbm [resolvable:$true] %s1127_s6 }
  0x13   : > { %s1499_s12 = sshra.s32 (!%p140_p10), %s1128_s6, 4  ;;  %s1500_s12 = int_to_ptr.hbm [resolvable:$true] %s1499_s12 }
  0x14   : > { %v1565_v0 = vmov 0   ;;  %s2077_s23 = smov (!%p167_p11, %s1220_s23), 31  ;;  %v1566_v17 = vmov 1   ;;  %v1567_v18 = vmov 2   ;;  %v1568_v22 = vmov 3   ;;  %v1330_v59 = vld [vmem:[%s2065_s1 + $0x38] sm:$0xff]  ;;  %p1506_p1 = scmp.lt.s32.totalorder %s1500_s12, %s2066_s2 }
  0x15   : > { %1467 = vset.pattern.permute.xlu2 %v1565_v0  ;;  %1466 = vset.pattern.permute.xlu1 %v1565_v0  ;;  %s1221_s24 = sshll.u32 %s2077_s23, 3  ;;  %v216_v26 = vlaneseq  ;;  %v1569_v32 = vmov 0.0   ;;  %s1501_s8 = scalar_lea.hbm %s1500_s12, 64 }
  0x16   : > { %1465 = vset.pattern.permute.xlu0 %v1565_v0  ;;  %s1646_s27 = scalar_lea.vmem %s2064_s0, %s1221_s24  ;;  %1380 = vmatpush.bf16.msra.mxu2 %v1330_v59  ;;  %p1502_p12 = scmp.ne.s32.totalorder %s1500_s12, %s1501_s8 }
  0x17   : > { %v1649_v1 = vld [vmem:[%s1646_s27 + $0x20] sm:$0xff]  ;;  %v1652_v2 = vld [vmem:[%s1646_s27 + $0x10] sm:$0xff]  ;;  %v1661_v4 = vld [vmem:[%s1646_s27 + $0x28] sm:$0xff]  ;;  %v1733_v30 = vand.u32 127, %v216_v26  ;;  %1381 = vmatpush.bf16.msra.mxu3 %v1330_v59  ;;  %980 = vmatpush.bf16.msra.mxu0 %v1330_v59  ;;  %p1507_p2 = scmp.lt.s32.totalorder %s1505_s18, %s1501_s8 }
  0x18   : > { %v1655_v3 = vld [vmem:[%s1646_s27] sm:$0xff]  ;;  %233 = vperm.xlu2 %1467, %v1649_v1   ;;  %227 = vperm.xlu1 %1466, %v1652_v2   ;;  %v1664_v5 = vld [vmem:[%s1646_s27 + $0x18] sm:$0xff]  ;;  %v1667_v6 = vld [vmem:[%s1646_s27 + $0x8] sm:$0xff]  ;;  %p1503_p13 = pnand %p1502_p12, %p1627_p4 }
  0x19   : > { %221 = vperm.xlu0 %1465, %v1655_v3   ;;  %v208_v7 = vld [vmem:[%s1646_s27 + $0x40] sm:$0xff]  ;;  %v1674_v8 = vld [vmem:[%s1646_s27 + $0x38] sm:$0xff]  ;;  %v1677_v9 = vld [vmem:[%s1646_s27 + $0x30] sm:$0xff]  ;;  %1379 = vmatpush.bf16.msra.mxu1 %v1330_v59  ;;  %p1508_p3 = por %p1507_p2, %p1506_p1 }
  0x1a   : > { %v1682_v10 = vld [vmem:[%s1646_s27 + $0x58] sm:$0xff]  ;;  %v1685_v11 = vld [vmem:[%s1646_s27 + $0x50] sm:$0xff]  ;;  %v209_v12 = vld [vmem:[%s1646_s27 + $0x48] sm:$0xff]  ;;  %p1504_p0 = pneg %p1503_p13 }
  0x1b   : > { %v1691_v13 = vld [vmem:[%s1646_s27 + $0x70] sm:$0xff]  ;;  %v213_v14 = vld [vmem:[%s1646_s27 + $0x68] sm:$0xff]  ;;  %v212_v15 = vld [vmem:[%s1646_s27 + $0x60] sm:$0xff] }
  0x1c   : > { %v1697_v16 = vld [vmem:[%s1646_s27 + $0x78] sm:$0xff]  ;;  %s1219_s27 = sshll.u32 %s163_s26, 6  ;;  %p1509_p5 = pnand %p1508_p3, %p1504_p0 }
  0x1d   : > { %s2015_s28 = scalar_lea.vmem [#allocation3], %s1219_s27 }
  0x1e   : > { %s1125_s5 = sshll.u32 %s2015_s28, 4  ;;  %s1126_s5 = int_to_ptr.vmem [resolvable:$true] %s1125_s5 }
  0x20   : > { %236 = vperm.xlu2 %1467, %v1661_v4   ;;  %230 = vperm.xlu1 %1466, %v1664_v5  }
  0x21   : > { %224 = vperm.xlu0 %1465, %v1667_v6  }
  0x28   : > { %245 = vperm.xlu2 %1467, %v208_v7   ;;  %242 = vperm.xlu1 %1466, %v1674_v8  }
  0x29   : > { %239 = vperm.xlu0 %1465, %v1677_v9  }
  0x30   : > { %254 = vperm.xlu2 %1467, %v1682_v10   ;;  %251 = vperm.xlu1 %1466, %v1685_v11  }
  0x31   : > { %248 = vperm.xlu0 %1465, %v209_v12  }
  0x38   : > { %263 = vperm.xlu2 %1467, %v1691_v13   ;;  %260 = vperm.xlu1 %1466, %v213_v14  }
  0x39   : > { %257 = vperm.xlu0 %1465, %v212_v15  }
  0x40   : > { %1469 = vset.pattern.permute.xlu2 %v1566_v17  ;;  %1468 = vset.pattern.permute.xlu1 %v1566_v17 }
  0x41   : > { %266 = vperm.xlu0 %1465, %v1697_v16   ;;  %384 = vperm.xlu2 %1469, %v1667_v6  }
  0x42   : > { %381 = vperm.xlu1 %1468, %v1655_v3  }
  0x49   : > { %1470 = vset.pattern.permute.xlu0 %v1566_v17  ;;  %393 = vperm.xlu2 %1469, %v1649_v1  }
  0x4a   : > { %390 = vperm.xlu1 %1468, %v1664_v5   ;;  %387 = vperm.xlu0 %1470, %v1652_v2  }
  0x51   : > { %399 = vperm.xlu2 %1469, %v1677_v9  }
  0x52   : > { %396 = vperm.xlu1 %1468, %v1661_v4   ;;  %402 = vperm.xlu0 %1470, %v1674_v8  }
  0x59   : > { %408 = vperm.xlu2 %1469, %v209_v12  }
  0x5a   : > { %405 = vperm.xlu1 %1468, %v208_v7   ;;  %411 = vperm.xlu0 %1470, %v1685_v11  }
  0x61   : > { %417 = vperm.xlu2 %1469, %v212_v15  }
  0x62   : > { %414 = vperm.xlu1 %1468, %v1682_v10   ;;  %420 = vperm.xlu0 %1470, %v213_v14  }
  0x69   : > { %1472 = vset.pattern.permute.xlu2 %v1567_v18 }
  0x6a   : > { %1471 = vset.pattern.permute.xlu1 %v1567_v18  ;;  %1473 = vset.pattern.permute.xlu0 %v1567_v18 }
  0x6b   : > { %584 = vperm.xlu2 %1472, %v209_v12   ;;  %581 = vperm.xlu1 %1471, %v208_v7  }
  0x6c   : > { %593 = vperm.xlu0 %1473, %v212_v15  }
  0x72   : > { %v234_v19 = vpop.permute.xlu2 %233 }
  0x73   : > { %557 = vperm.xlu2 %1472, %v1655_v3   ;;  %596 = vperm.xlu1 %1471, %v213_v14   ;;  %vm272_vm2 = vcmp.eq.s32.totalorder %v234_v19, %v1733_v30 }
  0x74   : > { %572 = vperm.xlu0 %1473, %v1661_v4   ;;  %v1226_v41 = vsel %vm272_vm2, 1.0, %v1569_v32 }
  0x7a   : > { %v1712_v20 = vpop.permute.xlu2 %236 }
  0x7b   : > { %569 = vperm.xlu2 %1472, %v1649_v1   ;;  %560 = vperm.xlu1 %1471, %v1667_v6  }
  0x7c   : > { %587 = vperm.xlu0 %1473, %v1685_v11  }
  0x82   : > { %v1717_v21 = vpop.permute.xlu2 %245 }
  0x83   : > { %1475 = vset.pattern.permute.xlu2 %v1568_v22  ;;  %1474 = vset.pattern.permute.xlu1 %v1568_v22 }
  0x84   : > { %566 = vperm.xlu0 %1473, %v1664_v5   ;;  %760 = vperm.xlu2 %1475, %v209_v12  }
  0x85   : > { %757 = vperm.xlu1 %1474, %v208_v7   ;;  %v1328_v7 = vld [vmem:[%s2065_s1 + $0x28] sm:$0xff] }
  0x8a   : > { %v1722_v23 = vpop.permute.xlu2 %254  ;;  %v1724_v24 = vpop.permute.xlu1 %227 }
  0x8b   : > { %v222_v25 = vpop.permute.xlu0 %221  ;;  %vm270_vm8 = vcmp.eq.s32.totalorder %v1724_v24, %v1733_v30 }
  0x8c   : > { %1482 = vset.pattern.permute.xlu0 %v1568_v22  ;;  %1476 = vset.pattern.permute.xlu2 %v1566_v17  ;;  %vm268_vm6 = vcmp.eq.s32.totalorder %v222_v25, %v1733_v30  ;;  %v1224_v60 = vsel %vm270_vm8, 1.0, %v1569_v32 }
  0x8d   : > { %772 = vperm.xlu1 %1474, %v213_v14   ;;  %769 = vperm.xlu0 %1482, %v212_v15   ;;  %v1222_v52 = vsel %vm268_vm6, 1.0, %v1569_v32 }
  0x8e   : > { %423 = vperm.xlu2 %1476, %v1691_v13  }
  0x92   : > { %v1728_v27 = vpop.permute.xlu2 %263  ;;  %v1730_v28 = vpop.permute.xlu1 %230 }
  0x93   : > { %v225_v29 = vpop.permute.xlu0 %224  ;;  %vm271_vm9 = vcmp.eq.s32.totalorder %v1730_v28, %v1733_v30  ;;  %vm282_vm6 = vcmp.eq.s32.totalorder %v1728_v27, %v1733_v30 }
  0x94   : > { %vm269_vm0 = vcmp.eq.s32.totalorder %v225_v29, %v1733_v30  ;;  %v1225_v61 = vsel %vm271_vm9, 1.0, %v1569_v32 }
  0x95   : > { %1477 = vset.pattern.permute.xlu1 %v1566_v17  ;;  %736 = vperm.xlu0 %1482, %v1667_v6   ;;  %v1223_v33 = vsel %vm269_vm0, 1.0, %v1569_v32  ;;  %vm279_vm0 = vcmp.eq.s32.totalorder %v1722_v23, %v1733_v30  ;;  %v1323_v23 = vld [vmem:[%s2065_s1] sm:$0xff] }
  0x96   : > { %1478 = vset.pattern.permute.xlu2 %v1568_v22  ;;  %426 = vperm.xlu1 %1477, %v1697_v16  }
  0x97   : > { %733 = vperm.xlu2 %1478, %v1655_v3   ;;  %v1329_v3 = vld [vmem:[%s2065_s1 + $0x30] sm:$0xff] }
  0x98   : > { %1383 = vmatpush.bf16.msra.mxu2 %v1329_v3  ;;  %1384 = vmatpush.bf16.msra.mxu3 %v1329_v3 }
  0x99   : > { %981 = vmatpush.bf16.msra.mxu0 %v1329_v3  ;;  %1382 = vmatpush.bf16.msra.mxu1 %v1329_v3 }
  0x9a   : > { %v1739_v31 = vpop.permute.xlu1 %242 }
  0x9b   : > { %v385_v34 = vpop.permute.xlu2 %384  ;;  %v240_v35 = vpop.permute.xlu0 %239  ;;  %vm275_vm12 = vcmp.eq.s32.totalorder %v1739_v31, %v1733_v30 }
  0x9c   : > { %vm429_vm1 = vcmp.eq.s32.totalorder %v385_v34, %v1733_v30  ;;  %vm274_vm4 = vcmp.eq.s32.totalorder %v240_v35, %v1733_v30  ;;  %1386 = vmatpush.bf16.msra.mxu2 %v1328_v7  ;;  %1387 = vmatpush.bf16.msra.mxu3 %v1328_v7 }
  0x9d   : > { %v1239_v36 = vsel %vm429_vm1, 1.0, %v1569_v32  ;;  %763 = vperm.xlu0 %1482, %v1685_v11   ;;  %v1228_v45 = vsel %vm274_vm4, 1.0, %v1569_v32  ;;  %982 = vmatpush.bf16.msra.mxu0 %v1328_v7 }
  0x9e   : > { %v1745_v37 = vadd.f32 %v1239_v36, %v1223_v33  ;;  %1479 = vset.pattern.permute.xlu1 %v1568_v22  ;;  %1385 = vmatpush.bf16.msra.mxu1 %v1328_v7 }
  0x9f   : > { %748 = vperm.xlu2 %1478, %v1661_v4   ;;  %745 = vperm.xlu1 %1479, %v1649_v1  }
  0xa2   : > { %v1751_v38 = vpop.permute.xlu1 %251 }
  0xa3   : > { %v394_v39 = vpop.permute.xlu2 %393  ;;  %v1753_v40 = vpop.permute.xlu0 %248  ;;  %vm278_vm14 = vcmp.eq.s32.totalorder %v1751_v38, %v1733_v30 }
  0xa4   : > { %vm432_vm3 = vcmp.eq.s32.totalorder %v394_v39, %v1733_v30  ;;  %vm277_vm2 = vcmp.eq.s32.totalorder %v1753_v40, %v1733_v30 }
  0xa5   : > { %v1242_v42 = vsel %vm432_vm3, 1.0, %v1569_v32  ;;  %742 = vperm.xlu0 %1482, %v1664_v5   ;;  %v1231_v35 = vsel %vm277_vm2, 1.0, %v1569_v32 }
  0xa6   : > { %v1759_v43 = vadd.f32 %v1242_v42, %v1226_v41 }
  0xa7   : > { %1481 = vset.pattern.permute.xlu2 %v1567_v18  ;;  %1480 = vset.pattern.permute.xlu1 %v1567_v18 }
  0xa8   : > { %599 = vperm.xlu2 %1481, %v1691_v13   ;;  %590 = vperm.xlu1 %1480, %v1682_v10  }
  0xaa   : > { %v1764_v44 = vpop.permute.xlu1 %260 }
  0xab   : > { %v400_v46 = vpop.permute.xlu2 %399  ;;  %v1767_v47 = vpop.permute.xlu0 %257  ;;  %vm281_vm8 = vcmp.eq.s32.totalorder %v1764_v44, %v1733_v30 }
  0xac   : > { %vm434_vm5 = vcmp.eq.s32.totalorder %v400_v46, %v1733_v30 }
  0xad   : > { %v1244_v48 = vsel %vm434_vm5, 1.0, %v1569_v32  ;;  %vm276_vm5 = vcmp.eq.s32.totalorder %v1717_v21, %v1733_v30  ;;  %v1236_v21 = vsel %vm282_vm6, 1.0, %v1569_v32 }
  0xae   : > { %v1771_v49 = vadd.f32 %v1244_v48, %v1228_v45  ;;  %v1230_v39 = vsel %vm276_vm5, 1.0, %v1569_v32  ;;  %vm273_vm5 = vcmp.eq.s32.totalorder %v1712_v20, %v1733_v30 }
  0xb0   : > { %563 = vperm.xlu2 %1481, %v1652_v2   ;;  %602 = vperm.xlu1 %1480, %v1697_v16  }
  0xb3   : > { %v1776_v50 = vpop.permute.xlu2 %408  ;;  %v1778_v51 = vpop.permute.xlu0 %266 }
  0xb4   : > { %v382_v53 = vpop.permute.xlu1 %381  ;;  %vm437_vm3 = vcmp.eq.s32.totalorder %v1776_v50, %v1733_v30 }
  0xb5   : > { %vm428_vm7 = vcmp.eq.s32.totalorder %v382_v53, %v1733_v30  ;;  %v1247_v36 = vsel %vm437_vm3, 1.0, %v1569_v32 }
  0xb6   : > { %v1238_v54 = vsel %vm428_vm7, 1.0, %v1569_v32  ;;  %v533_v40 = vadd.f32 %v1247_v36, %v1231_v35 }
  0xb7   : > { %v1783_v55 = vadd.f32 %v1238_v54, %v1222_v52 }
  0xb8   : > { %578 = vperm.xlu2 %1481, %v1674_v8   ;;  %575 = vperm.xlu1 %1480, %v1677_v9   ;;  %v549_v27 = vpack.c.bf16 %v533_v40, %v533_v40 }
  0xbb   : > { %v1791_v56 = vpop.permute.xlu2 %417 }
  0xbc   : > { %v391_v57 = vpop.permute.xlu1 %390  ;;  %v388_v58 = vpop.permute.xlu0 %387  ;;  %vm440_vm7 = vcmp.eq.s32.totalorder %v1791_v56, %v1733_v30 }
  0xbd   : > { %vm431_vm10 = vcmp.eq.s32.totalorder %v391_v57, %v1733_v30  ;;  %vm430_vm11 = vcmp.eq.s32.totalorder %v388_v58, %v1733_v30  ;;  %v1250_v48 = vsel %vm440_vm7, 1.0, %v1569_v32 }
  0xbe   : > { %v1241_v62 = vsel %vm431_vm10, 1.0, %v1569_v32  ;;  %v1240_v63 = vsel %vm430_vm11, 1.0, %v1569_v32  ;;  %vm280_vm10 = vcmp.eq.s32.totalorder %v1767_v47, %v1733_v30  ;;  %v1235_v47 = vsel %vm281_vm8, 1.0, %v1569_v32 }
  0xbf   : > { %v1802_v0 = vadd.f32 %v1241_v62, %v1225_v61  ;;  %v1804_v1 = vadd.f32 %v1240_v63, %v1224_v60  ;;  %v1234_v54 = vsel %vm280_vm10, 1.0, %v1569_v32  ;;  %v677_v60 = vunpack.c.l.bf16 %v549_v27 }
  0xc0   : > { %1484 = vset.pattern.permute.xlu2 %v1568_v22  ;;  %1483 = vset.pattern.permute.xlu1 %v1568_v22  ;;  %v1325_v22 = vld [vmem:[%s2065_s1 + $0x10] sm:$0xff]  ;;  %v536_v56 = vadd.f32 %v1250_v48, %v1234_v54 }
  0xc1   : > { %775 = vperm.xlu2 %1484, %v1691_v13   ;;  %766 = vperm.xlu1 %1483, %v1682_v10   ;;  %v1229_v10 = vsel %vm275_vm12, 1.0, %v1569_v32  ;;  %v1327_v13 = vld [vmem:[%s2065_s1 + $0x20] sm:$0xff] }
  0xc2   : > { %1389 = vmatpush.bf16.msra.mxu2 %v1327_v13  ;;  %1390 = vmatpush.bf16.msra.mxu3 %v1327_v13 }
  0xc3   : > { %983 = vmatpush.bf16.msra.mxu0 %v1327_v13  ;;  %1388 = vmatpush.bf16.msra.mxu1 %v1327_v13 }
  0xc4   : > { %v1815_v4 = vpop.permute.xlu1 %396  ;;  %v403_v5 = vpop.permute.xlu0 %402 }
  0xc5   : > { %vm435_vm13 = vcmp.eq.s32.totalorder %v403_v5, %v1733_v30  ;;  %v1818_v6 = vpop.permute.xlu2 %584  ;;  %vm433_vm2 = vcmp.eq.s32.totalorder %v1815_v4, %v1733_v30 }
  0xc6   : > { %v1245_v11 = vsel %vm435_vm13, 1.0, %v1569_v32  ;;  %vm613_vm12 = vcmp.eq.s32.totalorder %v1818_v6, %v1733_v30  ;;  %v552_v6 = vpack.c.bf16 %v536_v56, %v536_v56 }
  0xc7   : > { %v1825_v12 = vadd.f32 %v1245_v11, %v1229_v10  ;;  %v1263_v57 = vsel %vm613_vm12, 1.0, %v1569_v32 }
  0xc8   : > { %v709_v3 = vadd.f32 %v1263_v57, %v677_v60 }
  0xc9   : > { %739 = vperm.xlu2 %1484, %v1652_v2   ;;  %778 = vperm.xlu1 %1483, %v1697_v16   ;;  %v1326_v2 = vld [vmem:[%s2065_s1 + $0x18] sm:$0xff]  ;;  %v1232_v16 = vsel %vm278_vm14, 1.0, %v1569_v32 }
  0xca   : > { %1392 = vmatpush.bf16.msra.mxu2 %v1326_v2  ;;  %1393 = vmatpush.bf16.msra.mxu3 %v1326_v2  ;;  %v725_v11 = vpack.c.bf16 %v709_v3, %v709_v3 }
  0xcb   : > { %984 = vmatpush.bf16.msra.mxu0 %v1326_v2  ;;  %1391 = vmatpush.bf16.msra.mxu1 %v1326_v2 }
  0xcc   : > { %v406_v14 = vpop.permute.xlu1 %405  ;;  %v412_v15 = vpop.permute.xlu0 %411 }
  0xcd   : > { %vm438_vm15 = vcmp.eq.s32.totalorder %v412_v15, %v1733_v30  ;;  %v1835_v17 = vpop.permute.xlu2 %557  ;;  %vm436_vm4 = vcmp.eq.s32.totalorder %v406_v14, %v1733_v30  ;;  %v680_v15 = vunpack.c.l.bf16 %v552_v6 }
  0xce   : > { %v1248_v18 = vsel %vm438_vm15, 1.0, %v1569_v32  ;;  %1395 = vmatpush.bf16.msra.mxu2 %v1325_v22  ;;  %1396 = vmatpush.bf16.msra.mxu3 %v1325_v22  ;;  %v1246_v38 = vsel %vm436_vm4, 1.0, %v1569_v32  ;;  %vm604_vm3 = vcmp.eq.s32.totalorder %v1835_v17, %v1733_v30 }
  0xcf   : > { %v1842_v19 = vadd.f32 %v1248_v18, %v1232_v16  ;;  %985 = vmatpush.bf16.msra.mxu0 %v1325_v22  ;;  %1394 = vmatpush.bf16.msra.mxu1 %v1325_v22  ;;  %v532_v42 = vadd.f32 %v1246_v38, %v1230_v39  ;;  %v1243_v38 = vsel %vm433_vm2, 1.0, %v1569_v32  ;;  %v1254_v4 = vsel %vm604_vm3, 1.0, %v1569_v32 }
  0xd0   : > { %vm283_vm3 = vcmp.eq.s32.totalorder %v1778_v51, %v1733_v30 }
  0xd1   : > { %754 = vperm.xlu2 %1484, %v1674_v8   ;;  %751 = vperm.xlu1 %1483, %v1677_v9   ;;  %v1324_v8 = vld [vmem:[%s2065_s1 + $0x8] sm:$0xff]  ;;  %v1233_v9 = vsel %vm279_vm0, 1.0, %v1569_v32  ;;  %v548_v50 = vpack.c.bf16 %v532_v42, %v532_v42  ;;  %v1227_v42 = vsel %vm273_vm5, 1.0, %v1569_v32  ;;  %v1237_v51 = vsel %vm283_vm3, 1.0, %v1569_v32 }
  0xd2   : > { %1398 = vmatpush.bf16.msra.mxu2 %v1324_v8  ;;  %1399 = vmatpush.bf16.msra.mxu3 %v1324_v8 }
  0xd3   : > { %986 = vmatpush.bf16.msra.mxu0 %v1324_v8  ;;  %1397 = vmatpush.bf16.msra.mxu1 %v1324_v8  ;;  %v676_v61 = vunpack.c.l.bf16 %v548_v50  ;;  %v853_v8 = vunpack.c.l.bf16 %v725_v11 }
  0xd4   : > { %v415_v24 = vpop.permute.xlu1 %414  ;;  %v421_v25 = vpop.permute.xlu0 %420 }
  0xd5   : > { %vm439_vm1 = vcmp.eq.s32.totalorder %v415_v24, %v1733_v30  ;;  %v1852_v26 = vpop.permute.xlu2 %569  ;;  %vm441_vm9 = vcmp.eq.s32.totalorder %v421_v25, %v1733_v30 }
  0xd6   : > { %v1249_v28 = vsel %vm439_vm1, 1.0, %v1569_v32  ;;  %1401 = vmatpush.bf16.msra.mxu2 %v1323_v23  ;;  %1402 = vmatpush.bf16.msra.mxu3 %v1323_v23  ;;  %v1251_v44 = vsel %vm441_vm9, 1.0, %v1569_v32  ;;  %vm608_vm8 = vcmp.eq.s32.totalorder %v1852_v26, %v1733_v30 }
  0xd7   : > { %v1859_v29 = vadd.f32 %v1249_v28, %v1233_v9  ;;  %987 = vmatpush.bf16.msra.mxu0 %v1323_v23  ;;  %1400 = vmatpush.bf16.msra.mxu1 %v1323_v23  ;;  %v537_v62 = vadd.f32 %v1251_v44, %v1235_v47  ;;  %v540_v23 = vpack.c.bf16 %v1783_v55, %v1783_v55 }
  0xd9   : > { %v553_v10 = vpack.c.bf16 %v537_v62, %v537_v62  ;;  %v668_v40 = vunpack.c.l.bf16 %v540_v23 }
  0xdb   : > { %v681_v16 = vunpack.c.l.bf16 %v553_v10 }
  0xdd   : > { %v582_v31 = vpop.permute.xlu1 %581 }
  0xde   : > { %v594_v33 = vpop.permute.xlu0 %593  ;;  %v761_v34 = vpop.permute.xlu2 %760  ;;  %vm612_vm13 = vcmp.eq.s32.totalorder %v582_v31, %v1733_v30 }
  0xdf   : > { %v1262_v58 = vsel %vm612_vm13, 1.0, %v1569_v32  ;;  %vm616_vm14 = vcmp.eq.s32.totalorder %v594_v33, %v1733_v30  ;;  %vm789_vm0 = vcmp.eq.s32.totalorder %v761_v34, %v1733_v30  ;;  %v541_v34 = vpack.c.bf16 %v1745_v37, %v1745_v37 }
  0xe0   : > { %v708_v5 = vadd.f32 %v1262_v58, %v676_v61  ;;  %v1266_v14 = vsel %vm616_vm14, 1.0, %v1569_v32  ;;  %v1279_v24 = vsel %vm789_vm0, 1.0, %v1569_v32  ;;  %v544_v58 = vpack.c.bf16 %v1759_v43, %v1759_v43 }
  0xe1   : > { %v712_v22 = vadd.f32 %v1266_v14, %v680_v15  ;;  %v885_v35 = vadd.f32 %v1279_v24, %v853_v8  ;;  %v669_v37 = vunpack.c.l.bf16 %v541_v34 }
  0xe2   : > { %v724_v13 = vpack.c.bf16 %v708_v5, %v708_v5  ;;  %v672_v3 = vunpack.c.l.bf16 %v544_v58  ;;  %v1258_v5 = vsel %vm608_vm8, 1.0, %v1569_v32 }
  0xe3   : > { %v728_v55 = vpack.c.bf16 %v712_v22, %v712_v22 }
  0xe4   : > { %v852_v9 = vunpack.c.l.bf16 %v724_v13  ;;  %v704_v15 = vadd.f32 %v1258_v5, %v672_v3 }
  0xe5   : > { %v597_v41 = vpop.permute.xlu1 %596  ;;  %v856_v27 = vunpack.c.l.bf16 %v728_v55 }
  0xe6   : > { %v1879_v45 = vpop.permute.xlu0 %572  ;;  %vm617_vm15 = vcmp.eq.s32.totalorder %v597_v41, %v1733_v30 }
  0xe7   : > { %v1267_v2 = vsel %vm617_vm15, 1.0, %v1569_v32  ;;  %vm609_vm9 = vcmp.eq.s32.totalorder %v1879_v45, %v1733_v30 }
  0xe8   : > { %v424_v46 = vpop.permute.xlu2 %423  ;;  %v713_v28 = vadd.f32 %v1267_v2, %v681_v16  ;;  %v1259_v6 = vsel %vm609_vm9, 1.0, %v1569_v32 }
  0xe9   : > { %vm442_vm11 = vcmp.eq.s32.totalorder %v424_v46, %v1733_v30  ;;  %v700_v46 = vadd.f32 %v1254_v4, %v668_v40  ;;  %v543_v4 = vpack.c.bf16 %v1802_v0, %v1802_v0 }
  0xea   : > { %v1252_v52 = vsel %vm442_vm11, 1.0, %v1569_v32  ;;  %v729_v39 = vpack.c.bf16 %v713_v28, %v713_v28 }
  0xeb   : > { %v1894_v53 = vadd.f32 %v1252_v52, %v1236_v21  ;;  %v529_v21 = vadd.f32 %v1243_v38, %v1227_v42  ;;  %v716_v60 = vpack.c.bf16 %v700_v46, %v700_v46 }
  0xec   : > { %v857_v20 = vunpack.c.l.bf16 %v729_v39 }
  0xed   : > { %v561_v59 = vpop.permute.xlu1 %560  ;;  %v844_v13 = vunpack.c.l.bf16 %v716_v60 }
  0xee   : > { %v1900_v63 = vpop.permute.xlu0 %587  ;;  %vm605_vm4 = vcmp.eq.s32.totalorder %v561_v59, %v1733_v30  ;;  %v545_v59 = vpack.c.bf16 %v529_v21, %v529_v21 }
  0xef   : > { %v1255_v41 = vsel %vm605_vm4, 1.0, %v1569_v32  ;;  %vm614_vm4 = vcmp.eq.s32.totalorder %v1900_v63, %v1733_v30 }
  0xf0   : > { %v701_v52 = vadd.f32 %v1255_v41, %v669_v37  ;;  %v673_v11 = vunpack.c.l.bf16 %v545_v59  ;;  %v671_v41 = vunpack.c.l.bf16 %v543_v4 }
  0xf1   : > { %v1903_v7 = vpop.permute.xlu2 %733 }
  0xf2   : > { %v717_v61 = vpack.c.bf16 %v701_v52, %v701_v52  ;;  %vm780_vm10 = vcmp.eq.s32.totalorder %v1903_v7, %v1733_v30  ;;  %v705_v7 = vadd.f32 %v1259_v6, %v673_v11 }
  0xf3   : > { %v1270_v43 = vsel %vm780_vm10, 1.0, %v1569_v32 }
  0xf4   : > { %v845_v26 = vunpack.c.l.bf16 %v717_v61  ;;  %v876_v2 = vadd.f32 %v1270_v43, %v844_v13  ;;  %v721_v8 = vpack.c.bf16 %v705_v7, %v705_v7 }
  0xf6   : > { %v1909_v18 = vpop.permute.xlu0 %566 }
  0xf7   : > { %v758_v25 = vpop.permute.xlu1 %757  ;;  %vm607_vm14 = vcmp.eq.s32.totalorder %v1909_v18, %v1733_v30 }
  0xf8   : > { %vm788_vm1 = vcmp.eq.s32.totalorder %v758_v25, %v1733_v30  ;;  %v720_v25 = vpack.c.bf16 %v704_v15, %v704_v15 }
  0xf9   : > { %v1278_v31 = vsel %vm788_vm1, 1.0, %v1569_v32  ;;  %v749_v33 = vpop.permute.xlu2 %748 }
  0xfa   : > { %v884_v36 = vadd.f32 %v1278_v31, %v852_v9  ;;  %vm785_vm12 = vcmp.eq.s32.totalorder %v749_v33, %v1733_v30  ;;  %v848_v23 = vunpack.c.l.bf16 %v720_v25  ;;  %v849_v31 = vunpack.c.l.bf16 %v721_v8 }
  0xfb   : > { %v1275_v9 = vsel %vm785_vm12, 1.0, %v1569_v32  ;;  %v542_v33 = vpack.c.bf16 %v1804_v1, %v1804_v1  ;;  %v546_v25 = vpack.c.bf16 %v1771_v49, %v1771_v49  ;;  %v547_v8 = vpack.c.bf16 %v1825_v12, %v1825_v12 }
  0xfc   : > { %v896_v17 = vpack.c.bf16 %v885_v35, %v884_v36  ;;  %v881_v55 = vadd.f32 %v1275_v9, %v849_v31 }
  0xfd   : > { %v670_v42 = vunpack.c.l.bf16 %v542_v33  ;;  %v674_v12 = vunpack.c.l.bf16 %v546_v25 }
  0xfe   : > { %1008 = vmatmul.bf16.vlgmr.msra.gmra.mxu2 %v896_v17  ;;  %v1257_v17 = vsel %vm607_vm14, 1.0, %v1569_v32 }
  0xff   : > { %v773_v48 = vpop.permute.xlu1 %772  ;;  %v770_v50 = vpop.permute.xlu0 %769  ;;  %v703_v0 = vadd.f32 %v1257_v17, %v671_v41 }
 0x100   : > { %vm793_vm6 = vcmp.eq.s32.totalorder %v773_v48, %v1733_v30  ;;  %vm792_vm7 = vcmp.eq.s32.totalorder %v770_v50, %v1733_v30 }
 0x101   : > { %v1283_v44 = vsel %vm793_vm6, 1.0, %v1569_v32  ;;  %v1282_v54 = vsel %vm792_vm7, 1.0, %v1569_v32  ;;  %v719_v1 = vpack.c.bf16 %v703_v0, %v703_v0 }
 0x102   : > { %v889_v47 = vadd.f32 %v1283_v44, %v857_v20  ;;  %v888_v56 = vadd.f32 %v1282_v54, %v856_v27  ;;  %v1933_v57 = vpop.permute.xlu2 %599  ;;  %v550_v54 = vpack.c.bf16 %v1842_v19, %v1842_v19 }
 0x103   : > { %v847_v52 = vunpack.c.l.bf16 %v719_v1  ;;  %vm618_vm6 = vcmp.eq.s32.totalorder %v1933_v57, %v1733_v30 }
 0x104   : > { %v898_v62 = vpack.c.bf16 %v889_v47, %v888_v56  ;;  %v551_v47 = vpack.c.bf16 %v1859_v29, %v1859_v29  ;;  %v678_v3 = vunpack.c.l.bf16 %v550_v54 }
 0x106   : > { %1018 = vmatmul.bf16.vlgmr.msra.gmra.mxu3 %v898_v62  ;;  %v1264_v62 = vsel %vm614_vm4, 1.0, %v1569_v32  ;;  %v679_v29 = vunpack.c.l.bf16 %v551_v47 }
 0x107   : > { %v737_v10 = vpop.permute.xlu0 %736  ;;  %v710_v43 = vadd.f32 %v1264_v62, %v678_v3 }
 0x108   : > { %vm781_vm11 = vcmp.eq.s32.totalorder %v737_v10, %v1733_v30  ;;  %v427_v45 = vpop.permute.xlu1 %426  ;;  %v554_v10 = vpack.c.bf16 %v1894_v53, %v1894_v53 }
 0x109   : > { %v1271_v14 = vsel %vm781_vm11, 1.0, %v1569_v32  ;;  %vm443_vm1 = vcmp.eq.s32.totalorder %v427_v45, %v1733_v30  ;;  %v726_v13 = vpack.c.bf16 %v710_v43, %v710_v43 }
 0x10a   : > { %v877_v16 = vadd.f32 %v1271_v14, %v845_v26  ;;  %v564_v22 = vpop.permute.xlu2 %563  ;;  %v1253_v60 = vsel %vm443_vm1, 1.0, %v1569_v32  ;;  %v1268_v26 = vsel %vm618_vm6, 1.0, %v1569_v32  ;;  %v682_v14 = vunpack.c.l.bf16 %v554_v10 }
 0x10b   : > { %vm606_vm15 = vcmp.eq.s32.totalorder %v564_v22, %v1733_v30  ;;  %v539_v5 = vadd.f32 %v1253_v60, %v1237_v51  ;;  %v854_v22 = vunpack.c.l.bf16 %v726_v13 }
 0x10c   : > { %v892_v24 = vpack.c.bf16 %v877_v16, %v876_v2  ;;  %v1256_v40 = vsel %vm606_vm15, 1.0, %v1569_v32  ;;  %v714_v2 = vadd.f32 %v1268_v26, %v682_v14 }
 0x10d   : > { %v702_v46 = vadd.f32 %v1256_v40, %v670_v42  ;;  %v555_v11 = vpack.c.bf16 %v539_v5, %v539_v5 }
 0x10e   : > { %988 = vmatmul.bf16.vlgmr.msra.gmra.mxu0 %v892_v24  ;;  %v730_v31 = vpack.c.bf16 %v714_v2, %v714_v2 }
 0x10f   : > { %v764_v35 = vpop.permute.xlu0 %763  ;;  %v718_v48 = vpack.c.bf16 %v702_v46, %v702_v46  ;;  %v683_v7 = vunpack.c.l.bf16 %v555_v11 }
 0x110   : > { %vm790_vm8 = vcmp.eq.s32.totalorder %v764_v35, %v1733_v30  ;;  %v858_v4 = vunpack.c.l.bf16 %v730_v31 }
 0x111   : > { %v746_v28 = vpop.permute.xlu1 %745  ;;  %v846_v44 = vunpack.c.l.bf16 %v718_v48  ;;  %v1280_v16 = vsel %vm790_vm8, 1.0, %v1569_v32 }
 0x112   : > { %vm784_vm13 = vcmp.eq.s32.totalorder %v746_v28, %v1733_v30  ;;  %v1951_v34 = vpop.permute.xlu2 %578  ;;  %v886_v28 = vadd.f32 %v1280_v16, %v854_v22 }
 0x113   : > { %v1274_v36 = vsel %vm784_vm13, 1.0, %v1569_v32  ;;  %vm611_vm10 = vcmp.eq.s32.totalorder %v1951_v34, %v1733_v30 }
 0x114   : > { %v880_v38 = vadd.f32 %v1274_v36, %v848_v23  ;;  %v1261_v49 = vsel %vm611_vm10, 1.0, %v1569_v32 }
 0x116   : > { %v894_v39 = vpack.c.bf16 %v881_v55, %v880_v38  ;;  %v675_v38 = vunpack.c.l.bf16 %v547_v8 }
 0x117   : > { %v743_v27 = vpop.permute.xlu0 %742 }
 0x118   : > { %998 = vmatmul.bf16.vlgmr.msra.gmra.mxu1 %v894_v39  ;;  %vm783_vm0 = vcmp.eq.s32.totalorder %v743_v27, %v1733_v30  ;;  %v707_v39 = vadd.f32 %v1261_v49, %v675_v38 }
 0x119   : > { %v1273_v50 = vsel %vm783_vm0, 1.0, %v1569_v32 }
 0x11a   : > { %v591_v37 = vpop.permute.xlu1 %590  ;;  %v879_v58 = vadd.f32 %v1273_v50, %v847_v52  ;;  %v723_v0 = vpack.c.bf16 %v707_v39, %v707_v39 }
 0x11b   : > { %v1963_v21 = vpop.permute.xlu2 %775  ;;  %vm615_vm5 = vcmp.eq.s32.totalorder %v591_v37, %v1733_v30 }
 0x11c   : > { %v1265_v19 = vsel %vm615_vm5, 1.0, %v1569_v32  ;;  %vm794_vm12 = vcmp.eq.s32.totalorder %v1963_v21, %v1733_v30 }
 0x11d   : > { %v711_v63 = vadd.f32 %v1265_v19, %v679_v29  ;;  %v1284_v33 = vsel %vm794_vm12, 1.0, %v1569_v32 }
 0x11e   : > { %v890_v37 = vadd.f32 %v1284_v33, %v858_v4 }
 0x11f   : > { %v727_v45 = vpack.c.bf16 %v711_v63, %v711_v63 }
 0x121   : > { %v855_v24 = vunpack.c.l.bf16 %v727_v45 }
 0x122   : > { %v603_v18 = vpop.permute.xlu1 %602 }
 0x123   : > { %v740_v20 = vpop.permute.xlu2 %739  ;;  %vm619_vm7 = vcmp.eq.s32.totalorder %v603_v18, %v1733_v30  ;;  %v851_v18 = vunpack.c.l.bf16 %v723_v0 }
 0x124   : > { %vm782_vm2 = vcmp.eq.s32.totalorder %v740_v20, %v1733_v30  ;;  %v1269_v15 = vsel %vm619_vm7, 1.0, %v1569_v32 }
 0x125   : > { %v1272_v56 = vsel %vm782_vm2, 1.0, %v1569_v32  ;;  %v715_v57 = vadd.f32 %v1269_v15, %v683_v7 }
 0x126   : > { %v878_v59 = vadd.f32 %v1272_v56, %v846_v44 }
 0x127   : > { %v731_v35 = vpack.c.bf16 %v715_v57, %v715_v57 }
 0x128   : > { %v893_v61 = vpack.c.bf16 %v879_v58, %v878_v59 }
 0x129   : > { %v859_v17 = vunpack.c.l.bf16 %v731_v35 }
 0x12a   : > { %v576_v6 = vpop.permute.xlu1 %575  ;;  %993 = vmatmul.bf16.gmra.mxu0 %v893_v61 }
 0x12b   : > { %vm610_vm11 = vcmp.eq.s32.totalorder %v576_v6, %v1733_v30  ;;  %v755_v41 = vpop.permute.xlu2 %754 }
 0x12c   : > { %v1260_v55 = vsel %vm610_vm11, 1.0, %v1569_v32  ;;  %vm787_vm14 = vcmp.eq.s32.totalorder %v755_v41, %v1733_v30 }
 0x12d   : > { %v706_v40 = vadd.f32 %v1260_v55, %v674_v12  ;;  %v1277_v1 = vsel %vm787_vm14, 1.0, %v1569_v32 }
 0x12e   : > { %v883_v52 = vadd.f32 %v1277_v1, %v851_v18 }
 0x12f   : > { %v722_v46 = vpack.c.bf16 %v706_v40, %v706_v40 }
 0x131   : > { %v850_v50 = vunpack.c.l.bf16 %v722_v46 }
 0x133   : > { %v767_v53 = vpop.permute.xlu1 %766 }
 0x134   : > { %vm791_vm9 = vcmp.eq.s32.totalorder %v767_v53, %v1733_v30 }
 0x135   : > { %v1281_v9 = vsel %vm791_vm9, 1.0, %v1569_v32 }
 0x136   : > { %v887_v23 = vadd.f32 %v1281_v9, %v855_v24 }
 0x138   : > { %v897_v36 = vpack.c.bf16 %v887_v23, %v886_v28 }
 0x13a   : > { %1013 = vmatmul.bf16.gmra.mxu2 %v897_v36 }
 0x13b   : > { %v779_v34 = vpop.permute.xlu1 %778 }
 0x13c   : > { %vm795_vm13 = vcmp.eq.s32.totalorder %v779_v34, %v1733_v30 }
 0x13d   : > { %v1285_v42 = vsel %vm795_vm13, 1.0, %v1569_v32 }
 0x13e   : > { %v891_v21 = vadd.f32 %v1285_v42, %v859_v17 }
 0x140   : > { %v899_v27 = vpack.c.bf16 %v891_v21, %v890_v37 }
 0x142   : > { %1023 = vmatmul.bf16.gmra.mxu3 %v899_v27 }
 0x143   : > { %v752_v48 = vpop.permute.xlu1 %751 }
 0x144   : > { %vm786_vm15 = vcmp.eq.s32.totalorder %v752_v48, %v1733_v30 }
 0x145   : > { %v1276_v20 = vsel %vm786_vm15, 1.0, %v1569_v32 }
 0x146   : > { %v882_v44 = vadd.f32 %v1276_v20, %v850_v50 }
 0x148   : > { %v895_v54 = vpack.c.bf16 %v883_v52, %v882_v44 }
 0x14a   : > { %1003 = vmatmul.bf16.gmra.mxu1 %v895_v54 }
 0x181   : > { %v1009_v47 = vpop.f32.mrf.mxu2 }
 0x189   : > { %v1011_v56 = vpop.f32.mrf.mxu2  ;;  %v1019_v58 = vpop.f32.mrf.mxu3 }
 0x18a   : > { %v1355_v59 = vpack.c.bf16 %v1011_v56, %v1009_v47 }
 0x18b   : > { %v989_v60 = vpop.f32.mrf.mxu0 }
 0x18c   : > { %1375 = vst [vmem:[%s2015_s28 + $0x20] sm:$0xff] %v1355_v59  }
 0x191   : > { %v1021_v30 = vpop.f32.mrf.mxu3 }
 0x192   : > { %v1365_v32 = vpack.c.bf16 %v1021_v30, %v1019_v58 }
 0x193   : > { %v991_v61 = vpop.f32.mrf.mxu0 }
 0x194   : > { %1377 = vst [vmem:[%s2015_s28 + $0x30] sm:$0xff] %v1365_v32   ;;  %v1335_v51 = vpack.c.bf16 %v991_v61, %v989_v60 }
 0x195   : > { %v999_v62 = vpop.f32.mrf.mxu1 }
 0x196   : > { %1336 = vst [vmem:[%s2015_s28] sm:$0xff] %v1335_v51  }
 0x19d   : > { %v1001_v19 = vpop.f32.mrf.mxu1 }
 0x19e   : > { %v1345_v3 = vpack.c.bf16 %v1001_v19, %v999_v62 }
 0x1a0   : > { %1373 = vst [vmem:[%s2015_s28 + $0x10] sm:$0xff] %v1345_v3  }
 0x1a7   : > { %v994_v29 = vpop.f32.mrf.mxu0 }
 0x1af   : > { %v996_v5 = vpop.f32.mrf.mxu0 }
 0x1b0   : > { %v1340_v6 = vpack.c.bf16 %v996_v5, %v994_v29 }
 0x1b2   : > { %1372 = vst [vmem:[%s2015_s28 + $0x8] sm:$0xff] %v1340_v6  }
 0x1bd   : > { %v1014_v43 = vpop.f32.mrf.mxu2 }
 0x1c5   : > { %v1016_v63 = vpop.f32.mrf.mxu2  ;;  %v1024_v10 = vpop.f32.mrf.mxu3 }
 0x1c6   : > { %v1360_v11 = vpack.c.bf16 %v1016_v63, %v1014_v43 }
 0x1c7   : > { %v1004_v13 = vpop.f32.mrf.mxu1 }
 0x1c8   : > { %1376 = vst [vmem:[%s2015_s28 + $0x28] sm:$0xff] %v1360_v11  }
 0x1cd   : > { %v1026_v26 = vpop.f32.mrf.mxu3 }
 0x1ce   : > { %v1370_v45 = vpack.c.bf16 %v1026_v26, %v1024_v10 }
 0x1cf   : > { %v1006_v14 = vpop.f32.mrf.mxu1 }
 0x1d0   : > { %1378 = vst [vmem:[%s2015_s28 + $0x38] sm:$0xff] %v1370_v45   ;;  %v1350_v15 = vpack.c.bf16 %v1006_v14, %v1004_v13 }
 0x1d2   : > { %1374 = vst [vmem:[%s2015_s28 + $0x18] sm:$0xff] %v1350_v15  }
 0x1d3   : > { %1512 = shalt.err (!%p1509_p5)
}
 0x1d4   : > { %s1570_s24 = smov 64   ;;  %s1571_s25 = smov 4  }
 0x1d5   : > { %1403 = dma.vmem_to_hbm [thread:$0]  (%p1627_p4), %s1126_s5, 1024, %s1128_s6, %s1113_s7, %s1570_s24, %s1570_s24, %s1571_s25  }
 0x1d6 PF: > { %p1409_p6 = scmp.ge.s32.totalorder %s1563_s14, 2  ;;  %s1142_s26 = sand.u32 1, %s1543_s9  }
 0x1d7   : > { %s1143_s27 = scalar_lea.sflag [#allocation4], %s1142_s26 }
 0x1d8   : > { %p1406_p7 = pnand %p1409_p6, %p1634_p8 }
 0x1da   : > { %p1407_p9 = pneg %p1406_p7 }
 0x1dc   : > { %1538 = dma.done.wait (%p1407_p9), %s1143_s27, 1024  }
 0x1dd   : > { %1540 = vsyncadd (%p1407_p9), %s1143_s27, 4294966272  ;;  %s15_s14 = sadd.s32 1, %s1563_s14   ;;  %s2069_s9 = smov %s1547_s10 }
 0x1de   : > { %p12_p10 = scmp.ge.s32.totalorder %s15_s14, 4   ;;  %s2070_s10 = smov %s1551_s11 }
 0x1df   : > { %s2071_s11 = smov %s1640_s22  ;;  %s2072_s12 = smov %s1559_s13 }
 0x1e0   : > { %s2073_s13 = smov %s2075_s17  ;;  %14 = sbr.rel (!%p12_p10) target bundleno = 4 (0x4), region = 74 }
 0x1e5   :  { %1149 = vsyncpa [#allocation4], 1 }
 0x1e6   :  { %1151 = vsyncpa [#allocation4 + $0x1], 1 }

</bundles_post_ra>
